<compile_context>
chip_gen: v7x
topology: tpu7x:2x2x1
jax: 0.10.0
libtpu: 0.0.40
codegen_flags: <defaults>
</compile_context>

<pallas_src>
import math
import functools

import jax
import jax.numpy as jnp
from jax.experimental import pallas as pl
from jax.experimental.pallas import tpu as pltpu


def _round_up(x, m):
    return ((x + m - 1) // m) * m


def _vmem_budget_bytes():
    """Generation-aware VMEM budget (~80% of physical, leaving compiler headroom)."""
    cap = None
    try:
        cap = getattr(pltpu.get_tpu_info(), "vmem_capacity_bytes", None)
    except Exception:
        cap = None
    if not cap:
        cap = 64 * 1024 * 1024          # conservative fallback, valid on every generation
    return int(cap * 0.8)               # ~51 MiB on v7x, ~102 MiB on v5e/v6e


def prepare_operator(adj, in_degrees, n_pad):
    """M = 0.5 * (I - D^-1/2 A^T D^-1/2), zero-padded to [n_pad, n_pad], bf16.

    Build once and pass as `m_operator=` to bernstein_conv when the graph is static
    (avoids re-reading several f32 N^2 arrays from HBM on every layer/term).
    DGL's copy_u+sum aggregates along A^T; for undirected graphs A^T == A.
    """
    adj = jnp.asarray(adj, jnp.float32)
    n = adj.shape[0]
    dinv = jnp.power(jnp.clip(jnp.asarray(in_degrees, jnp.float32), 1.0, None), -0.5)
    a_hat = dinv[:, None] * adj.T * dinv[None, :]
    m = (0.5 * (jnp.eye(n, dtype=jnp.float32) - a_hat)).astype(jnp.bfloat16)
    if n_pad != n:
        m = jnp.zeros((n_pad, n_pad), jnp.bfloat16).at[:n, :n].set(m)
    return m


def _bernstein_kernel(*refs, k, n, tm, fp, comb, lin, neg_slope):
    general = 0 < k < n
    n_steps = max(k, n - k) if general else n
    needs_f32 = general and (k != n - k)     # a finished half must be carried forward exactly

    it = iter(refs)
    m_ref = next(it)                         # [tm, N_pad]  bf16 row panel of M
    feat_ref = next(it)                      # [N_pad, fp]  f32, VMEM-resident
    w_ref = next(it) if lin else None        # [fp, fo_p]   bf16, comb folded in
    out_ref = next(it)                       # [tm, fo_p]   f32
    carry_b_ref = next(it)                   # [2, N_pad, W] bf16 ping-pong (MXU rhs)
    carry_f_ref = next(it) if needs_f32 else None   # [2, N_pad, W] f32 exact carries

    s = pl.program_id(0)                     # recurrence step (outer)
    r = pl.program_id(1)                     # row panel (inner)
    last = pl.num_programs(0) - 1
    row0 = pl.multiple_of(r * tm, tm)
    rows = pl.ds(row0, tm)

    # One-time init of the ping-pong carry (slot 0) with feat; for the general branch both
    # halves (t and p) start from feat.
    @pl.when(jnp.logical_and(s == 0, r == 0))
    def _init():
        fb = feat_ref[...].astype(jnp.bfloat16)
        carry_b_ref[0, :, 0:fp] = fb
        if general:
            carry_b_ref[0, :, fp:2 * fp] = fb
        if needs_f32:
            ff = feat_ref[...]
            carry_f_ref[0, :, 0:fp] = ff
            carry_f_ref[0, :, fp:2 * fp] = ff

    slot = s % 2
    nxt = 1 - slot

    # M_panel @ carry on the MXU: bf16 operands, f32 accumulation.  Lap == unnLaplacian(.)/2.
    lap = jnp.dot(m_ref[...], carry_b_ref[slot], preferred_element_type=jnp.float32)
    feat_panel = feat_ref[rows, :]           # [tm, fp] f32

    if k == 0:
        # h <- feat - M @ h
        h_panel = feat_panel - lap
        carry_b_ref[nxt, rows, :] = h_panel.astype(jnp.bfloat16)
    elif k == n:
        # h <- M @ h
        h_panel = lap
        carry_b_ref[nxt, rows, :] = h_panel.astype(jnp.bfloat16)
    else:
        # t <- M @ t (k times), p <- feat - M @ p (n-k times), batched as one [.. | ..] rhs.
        # fp is a multiple of 128 so the split is lane-tile aligned (no relayout copies).
        t_new = lap[:, 0:fp]
        p_new = feat_panel - lap[:, fp:2 * fp]
        if k == n_steps:
            t_panel = t_new
        else:
            t_panel = jnp.where(s < k, t_new, carry_f_ref[slot, rows, 0:fp])
        if (n - k) == n_steps:
            p_panel = p_new
        else:
            p_panel = jnp.where(s < (n - k), p_new, carry_f_ref[slot, rows, fp:2 * fp])
        carry_b_ref[nxt, rows, 0:fp] = t_panel.astype(jnp.bfloat16)
        carry_b_ref[nxt, rows, fp:2 * fp] = p_panel.astype(jnp.bfloat16)
        if needs_f32:
            carry_f_ref[nxt, rows, 0:fp] = t_panel
            carry_f_ref[nxt, rows, fp:2 * fp] = p_panel
        h_panel = t_panel * p_panel

    @pl.when(s == last)
    def _store():
        if lin:
            # comb is folded into w (wrapper passes comb * W^T in bf16); leaky_relu after.
            y = jnp.dot(h_panel.astype(jnp.bfloat16), w_ref[...],
                        preferred_element_type=jnp.float32)
            out_ref[...] = jnp.where(y >= 0.0, y, neg_slope * y)
        else:
            out_ref[...] = comb * h_panel


def bernstein_conv(adj, feat, in_degrees, weight=None, *, k, n=2, lin=False,
                   neg_slope=0.01, block_rows=None, m_operator=None):
    """adj:[N,N] dense 0/1 adjacency (A[u,v]=1 for edge u->v), feat:[N,F_in],
    in_degrees:[N], weight:[F_out,F_in] (only used when lin=True)."""
    feat = jnp.asarray(feat, jnp.float32)
    N, f_in = feat.shape
    comb = float(math.comb(n, k))
    general = 0 < k < n
    n_steps = max(k, n - k) if general else n

    # Pad node and feature axes to multiples of 128 (lane-dense matmuls, unmasked stores,
    # aligned [t|p] split).  Zero padding is exact: padded rows/cols of M are zero, padded
    # feat entries are zero, padded weight rows/cols are zero.
    n_pad = max(_round_up(N, 128), 128)
    fp = max(_round_up(f_in, 128), 128)
    f_out = int(weight.shape[0]) if lin else f_in
    fo_p = max(_round_up(f_out, 128), 128)
    w_carry = 2 * fp if general else fp
    needs_f32 = general and (k != n - k)

    m_mat = prepare_operator(adj, in_degrees, n_pad) if m_operator is None else m_operator
    feat_p = jnp.zeros((n_pad, fp), jnp.float32).at[:N, :f_in].set(feat)

    args = [m_mat, feat_p]
    if lin:
        w_scaled = comb * jnp.asarray(weight, jnp.float32).T            # [f_in, f_out]
        w_p = jnp.zeros((fp, fo_p), jnp.bfloat16).at[:f_in, :f_out].set(
            w_scaled.astype(jnp.bfloat16))
        args.append(w_p)

    # ---- generation-aware VMEM budget & row-panel size -----------------------------------
    budget = _vmem_budget_bytes()

    def _footprint(tm):
        m_b = 2 * tm * n_pad * 2                                        # double-buffered M panels
        feat_b = 2 * n_pad * fp * 4
        w_b = 2 * fp * fo_p * 2 if lin else 0
        out_b = 2 * tm * fo_p * 4
        carry_b = 2 * n_pad * w_carry * 2 + (2 * n_pad * w_carry * 4 if needs_f32 else 0)
        return m_b + feat_b + w_b + out_b + carry_b

    if block_rows is not None:
        tm = int(block_rows)
    else:
        candidates = sorted({c for c in (n_pad, 2048, 1024, 512, 256, 128)
                             if c <= n_pad and n_pad % c == 0}, reverse=True)
        tm = candidates[-1]
        for c in candidates:
            if _footprint(c) <= budget:
                tm = c
                break
    assert n_pad % tm == 0 and tm % 128 == 0, (n_pad, tm)
    # TODO(synk): if even tm=128 overflows the budget (very large graphs), the carries
    # themselves need to be streamed/tiled as well.

    vmem_limit = int(min(budget, max(_footprint(tm) + 8 * 1024 * 1024, 32 * 1024 * 1024)))
    grid = (n_steps, n_pad // tm)

    kernel = functools.partial(_bernstein_kernel, k=k, n=n, tm=tm, fp=fp,
                               comb=comb, lin=lin, neg_slope=neg_slope)

    in_specs = [
        # M row panel: streamed & double-buffered; with a single panel the block index is
        # constant so it is fetched into VMEM exactly once (resident fast path).
        pl.BlockSpec((tm, n_pad), lambda s, r: (r, 0)),
        pl.BlockSpec((n_pad, fp), lambda s, r: (0, 0)),                 # feat: resident
    ]
    if lin:
        in_specs.append(pl.BlockSpec((fp, fo_p), lambda s, r: (0, 0)))  # weight: resident

    scratch = [pltpu.VMEM((2, n_pad, w_carry), jnp.bfloat16)]           # ping-pong MXU rhs
    if needs_f32:
        scratch.append(pltpu.VMEM((2, n_pad, w_carry), jnp.float32))    # exact f32 carries

    out = pl.pallas_call(
        kernel,
        out_shape=jax.ShapeDtypeStruct((n_pad, fo_p), jnp.float32),
        grid=grid,
        in_specs=in_specs,
        out_specs=pl.BlockSpec((tm, fo_p), lambda s, r: (r, 0)),
        scratch_shapes=scratch,
        compiler_params=pltpu.CompilerParams(
            dimension_semantics=("arbitrary", "arbitrary"),
            vmem_limit_bytes=vmem_limit,
        ),
    )(*args)

    return out[:N, :f_out]


def bernstein_conv_ref(adj, feat, in_degrees, weight=None, *, k, n=2, lin=False,
                       neg_slope=0.01):
    """Pure-JAX f32 reference mirroring the PyTorch forward exactly."""
    comb = float(math.comb(n, k))
    dinv = jnp.power(jnp.clip(in_degrees.astype(jnp.float32), 1.0, None), -0.5)[:, None]
    adj_t = jnp.asarray(adj, jnp.float32).T
    feat = jnp.asarray(feat, jnp.float32)

    def unn(h):
        return h - (adj_t @ (h * dinv)) * dinv

    if k == 0:
        h = feat
        for _ in range(n):
            h = feat - unn(h) / 2
    elif k == n:
        h = feat
        for _ in range(n):
            h = unn(h) / 2
    else:
        temp = feat
        for _ in range(k):
            temp = unn(temp) / 2
        h_part = feat
        for _ in range(n - k):
            h_part = feat - unn(h_part) / 2
        h = temp * h_part
    h = comb * h
    if lin:
        h = h @ jnp.asarray(weight, jnp.float32).T
        h = jnp.where(h >= 0, h, neg_slope * h)
    return h


def _make_inputs(key, n_nodes, f_in, f_out, p_edge=0.1):
    k_adj, k_feat, k_w = jax.random.split(key, 3)
    u = jax.random.uniform(k_adj, (n_nodes, n_nodes))
    upper = jnp.triu((u < p_edge).astype(jnp.float32), 1)
    adj = upper + upper.T                        # symmetric 0/1, no self loops
    in_deg = jnp.sum(adj, axis=0)                # in-degree = column sum (A[u,v] = edge u->v)
    feat = jax.random.normal(k_feat, (n_nodes, f_in), dtype=jnp.float32)
    bound = 1.0 / math.sqrt(f_in)
    w = jax.random.uniform(k_w, (f_out, f_in), minval=-bound, maxval=bound,
                           dtype=jnp.float32)   # nn.Linear weight: [out_feats, in_feats]
    return adj, feat, in_deg, w


def _check(out, ref, cfg, tol=3e-2):
    assert out.shape == ref.shape, f"shape mismatch for {cfg}: {out.shape} vs {ref.shape}"
    err = float(jnp.max(jnp.abs(out - ref)))
    scale = float(jnp.max(jnp.abs(ref))) + 1e-6
    # bf16 operator / rhs / linear weight -> max-norm relative comparison.
    assert err / scale < tol, f"Pallas kernel mismatch for {cfg}: err={err}, scale={scale}"


if __name__ == "__main__":
    # Small graph: exercises every branch (k==0, k==n, general with/without carry-forward)
    # and both lin modes on the single-panel (resident) path.
    adj, feat, in_deg, w = _make_inputs(jax.random.PRNGKey(0), 64, 32, 16)
    for cfg in [
        dict(k=1, n=2, lin=True),    # general, k == n-k, linear + leaky_relu
        dict(k=2, n=5, lin=False),   # general, t half carried forward on the last step
        dict(k=3, n=5, lin=True),    # general, p half carried forward on the last step
        dict(k=0, n=2, lin=False),   # k == 0 branch
        dict(k=2, n=2, lin=True),    # k == n branch
    ]:
        w_arg = w if cfg["lin"] else None
        out = jax.block_until_ready(bernstein_conv(adj, feat, in_deg, w_arg, **cfg))
        _check(out, bernstein_conv_ref(adj, feat, in_deg, w_arg, **cfg), cfg)

    # Non-multiple-of-128 node count + forced multi-panel streaming of M (2 row panels),
    # exercising the ping-pong carry across panels and padding correctness.
    adj2, feat2, deg2, w2 = _make_inputs(jax.random.PRNGKey(0), 200, 48, 24, p_edge=0.05)
    for cfg in [dict(k=1, n=3, lin=True), dict(k=2, n=4, lin=False)]:
        w_arg = w2 if cfg["lin"] else None
        out = jax.block_until_ready(
            bernstein_conv(adj2, feat2, deg2, w_arg, block_rows=128, **cfg))
        _check(out, bernstein_conv_ref(adj2, feat2, deg2, w_arg, **cfg), cfg)

    print("KERNEL_OK")
</pallas_src>

<mosaic_0001>
module attributes {stable_mosaic.version = 11 : i64} {
  func.func @_bernstein_kernel(%arg0: i32, %arg1: i32, %arg2: memref<128x128xbf16, #tpu.memory_space<vmem>>, %arg3: memref<128x128xf32, #tpu.memory_space<vmem>>, %arg4: memref<128x128xbf16, #tpu.memory_space<vmem>>, %arg5: memref<128x128xf32, #tpu.memory_space<vmem>>, %arg6: memref<2x128x256xbf16, #tpu.memory_space<vmem>>) attributes {dimension_semantics = [#tpu.dimension_semantics<arbitrary>, #tpu.dimension_semantics<arbitrary>], iteration_bounds = array<i64: 1, 1>, scalar_prefetch = 0 : i64, scratch_operands = 1 : i64, tpu.core_type = #tpu.core_type<tc>, window_params = [{transform_indices = @transform_0, window_bounds = array<i64: 128, 128>}, {pipeline_mode = #tpu.pipeline_mode<synchronous>, transform_indices = @transform_1, window_bounds = array<i64: 128, 128>}, {pipeline_mode = #tpu.pipeline_mode<synchronous>, transform_indices = @transform_2, window_bounds = array<i64: 128, 128>}, {transform_indices = @transform_3, window_bounds = array<i64: 128, 128>}]} {
    %c128_i32 = arith.constant 128 : i32
    %0 = arith.muli %arg1, %c128_i32 : i32
    %1 = tpu.assume_multiple %0, 128 : i32
    %c0_i32 = arith.constant 0 : i32
    %2 = arith.cmpi eq, %arg0, %c0_i32 : i32
    %c0_i32_0 = arith.constant 0 : i32
    %3 = arith.cmpi eq, %arg1, %c0_i32_0 : i32
    %4 = arith.andi %2, %3 : i1
    %5 = arith.extui %4 : i1 to i32
    %c0_i32_1 = arith.constant 0 : i32
    %6 = arith.cmpi ne, %5, %c0_i32_1 : i32
    scf.if %6 {
      %c0_14 = arith.constant 0 : index
      %c0_15 = arith.constant 0 : index
      %44 = vector.load %arg3[%c0_14, %c0_15] : memref<128x128xf32, #tpu.memory_space<vmem>>, vector<128x128xf32>
      %45 = arith.truncf %44 : vector<128x128xf32> to vector<128x128xbf16>
      %c0_16 = arith.constant 0 : index
      %c0_17 = arith.constant 0 : index
      %c0_18 = arith.constant 0 : index
      %46 = vector.load %arg6[%c0_16, %c0_17, %c0_18] : memref<2x128x256xbf16, #tpu.memory_space<vmem>>, vector<1x128x128xbf16>
      %47 = vector.shape_cast %46 : vector<1x128x128xbf16> to vector<128x128xbf16>
      %48 = vector.shape_cast %45 : vector<128x128xbf16> to vector<1x128x128xbf16>
      tpu.vector_store %arg6[%c0_16, %c0_17, %c0_18], %48 {strides = array<i32>} : memref<2x128x256xbf16, #tpu.memory_space<vmem>>, vector<1x128x128xbf16>,
      %c0_19 = arith.constant 0 : index
      %c0_20 = arith.constant 0 : index
      %c128_21 = arith.constant 128 : index
      %49 = vector.load %arg6[%c0_19, %c0_20, %c128_21] : memref<2x128x256xbf16, #tpu.memory_space<vmem>>, vector<1x128x128xbf16>
      %50 = vector.shape_cast %49 : vector<1x128x128xbf16> to vector<128x128xbf16>
      %51 = vector.shape_cast %45 : vector<128x128xbf16> to vector<1x128x128xbf16>
      tpu.vector_store %arg6[%c0_19, %c0_20, %c128_21], %51 {strides = array<i32>} : memref<2x128x256xbf16, #tpu.memory_space<vmem>>, vector<1x128x128xbf16>,
    } else {
    }
    %c2_i32 = arith.constant 2 : i32
    %c0_i32_2 = arith.constant 0 : i32
    %7 = arith.cmpi eq, %c2_i32, %c0_i32_2 : i32
    %c1_i32 = arith.constant 1 : i32
    %8 = arith.select %7, %c1_i32, %c2_i32 : i32
    %9 = arith.remsi %arg0, %8 : i32
    %c0_i32_3 = arith.constant 0 : i32
    %10 = arith.cmpi ne, %9, %c0_i32_3 : i32
    %c0_i32_4 = arith.constant 0 : i32
    %11 = arith.cmpi slt, %9, %c0_i32_4 : i32
    %c0_i32_5 = arith.constant 0 : i32
    %12 = arith.cmpi slt, %8, %c0_i32_5 : i32
    %13 = arith.xori %11, %12 : i1
    %14 = arith.andi %13, %10 : i1
    %15 = arith.addi %9, %8 : i32
    %16 = arith.select %14, %15, %9 : i32
    %c1_i32_6 = arith.constant 1 : i32
    %17 = arith.subi %c1_i32_6, %16 : i32
    %c0 = arith.constant 0 : index
    %c0_7 = arith.constant 0 : index
    %18 = vector.load %arg2[%c0, %c0_7] : memref<128x128xbf16, #tpu.memory_space<vmem>>, vector<128x128xbf16>
    %19 = arith.index_cast %16 : i32 to index
    %c0_8 = arith.constant 0 : index
    %c0_9 = arith.constant 0 : index
    %20 = vector.load %arg6[%19, %c0_8, %c0_9] : memref<2x128x256xbf16, #tpu.memory_space<vmem>>, vector<1x128x256xbf16>
    %21 = vector.shape_cast %20 : vector<1x128x256xbf16> to vector<128x256xbf16>
    %cst = arith.constant dense<0.000000e+00> : vector<128x256xf32>
    %22 = tpu.matmul %18, %21, %cst {dimension_numbers = #tpu.dot_dimension_numbers<[1], [0], [0], [1], [0, 0, 1, 1], [], []>} : vector<128x128xbf16>, vector<128x256xbf16>, vector<128x256xf32> -> vector<128x256xf32>
    %23 = arith.index_cast %1 : i32 to index
    %c0_10 = arith.constant 0 : index
    %24 = vector.load %arg3[%23, %c0_10] : memref<128x128xf32, #tpu.memory_space<vmem>>, vector<128x128xf32>
    %25 = vector.extract_strided_slice %22 {offsets = [0, 0], sizes = [128, 128], strides = [1, 1]} : vector<128x256xf32> to vector<128x128xf32>
    %26 = vector.extract_strided_slice %22 {offsets = [0, 128], sizes = [128, 128], strides = [1, 1]} : vector<128x256xf32> to vector<128x128xf32>
    %27 = arith.subf %24, %26 : vector<128x128xf32>
    %28 = arith.truncf %25 : vector<128x128xf32> to vector<128x128xbf16>
    %29 = arith.index_cast %17 : i32 to index
    %30 = arith.index_cast %1 : i32 to index
    %c0_11 = arith.constant 0 : index
    %31 = vector.load %arg6[%29, %30, %c0_11] : memref<2x128x256xbf16, #tpu.memory_space<vmem>>, vector<1x128x128xbf16>
    %32 = vector.shape_cast %31 : vector<1x128x128xbf16> to vector<128x128xbf16>
    %33 = vector.shape_cast %28 : vector<128x128xbf16> to vector<1x128x128xbf16>
    tpu.vector_store %arg6[%29, %30, %c0_11], %33 {strides = array<i32>} : memref<2x128x256xbf16, #tpu.memory_space<vmem>>, vector<1x128x128xbf16>,
    %34 = arith.truncf %27 : vector<128x128xf32> to vector<128x128xbf16>
    %35 = arith.index_cast %17 : i32 to index
    %36 = arith.index_cast %1 : i32 to index
    %c128 = arith.constant 128 : index
    %37 = vector.load %arg6[%35, %36, %c128] : memref<2x128x256xbf16, #tpu.memory_space<vmem>>, vector<1x128x128xbf16>
    %38 = vector.shape_cast %37 : vector<1x128x128xbf16> to vector<128x128xbf16>
    %39 = vector.shape_cast %34 : vector<128x128xbf16> to vector<1x128x128xbf16>
    tpu.vector_store %arg6[%35, %36, %c128], %39 {strides = array<i32>} : memref<2x128x256xbf16, #tpu.memory_space<vmem>>, vector<1x128x128xbf16>,
    %40 = arith.mulf %25, %27 : vector<128x128xf32>
    %c0_i32_12 = arith.constant 0 : i32
    %41 = arith.cmpi eq, %arg0, %c0_i32_12 : i32
    %42 = arith.extui %41 : i1 to i32
    %c0_i32_13 = arith.constant 0 : i32
    %43 = arith.cmpi ne, %42, %c0_i32_13 : i32
    scf.if %43 {
      %44 = arith.truncf %40 : vector<128x128xf32> to vector<128x128xbf16>
      %c0_14 = arith.constant 0 : index
      %c0_15 = arith.constant 0 : index
      %45 = vector.load %arg4[%c0_14, %c0_15] : memref<128x128xbf16, #tpu.memory_space<vmem>>, vector<128x128xbf16>
      %cst_16 = arith.constant dense<0.000000e+00> : vector<128x128xf32>
      %46 = tpu.matmul %44, %45, %cst_16 {dimension_numbers = #tpu.dot_dimension_numbers<[1], [0], [0], [1], [0, 0, 1, 1], [], []>} : vector<128x128xbf16>, vector<128x128xbf16>, vector<128x128xf32> -> vector<128x128xf32>
      %cst_17 = arith.constant 0.000000e+00 : f32
      %47 = vector.broadcast %cst_17 : f32 to vector<128x128xf32>
      %48 = arith.cmpf oge, %46, %47 : vector<128x128xf32>
      %cst_18 = arith.constant 0.00999999977 : f32
      %49 = vector.broadcast %cst_18 : f32 to vector<128x128xf32>
      %50 = arith.mulf %49, %46 : vector<128x128xf32>
      %51 = arith.select %48, %46, %50 : vector<128x128xi1>, vector<128x128xf32>
      %c0_19 = arith.constant 0 : index
      %c0_20 = arith.constant 0 : index
      %52 = vector.load %arg5[%c0_19, %c0_20] : memref<128x128xf32, #tpu.memory_space<vmem>>, vector<128x128xf32>
      tpu.vector_store %arg5[%c0_19, %c0_20], %51 {strides = array<i32>} : memref<128x128xf32, #tpu.memory_space<vmem>>, vector<128x128xf32>,
    } else {
    }
    return
  }
  func.func @transform_0(%arg0: i32, %arg1: i32) -> (i32, i32) {
    %c0_i32 = arith.constant 0 : i32
    %c0_i32_0 = arith.constant 0 : i32
    return %arg1, %c0_i32 : i32, i32
  }
  func.func @transform_1(%arg0: i32, %arg1: i32) -> (i32, i32) {
    %c0_i32 = arith.constant 0 : i32
    %c0_i32_0 = arith.constant 0 : i32
    %c0_i32_1 = arith.constant 0 : i32
    return %c0_i32, %c0_i32_0 : i32, i32
  }
  func.func @transform_2(%arg0: i32, %arg1: i32) -> (i32, i32) {
    %c0_i32 = arith.constant 0 : i32
    %c0_i32_0 = arith.constant 0 : i32
    %c0_i32_1 = arith.constant 0 : i32
    return %c0_i32, %c0_i32_0 : i32, i32
  }
  func.func @transform_3(%arg0: i32, %arg1: i32) -> (i32, i32) {
    %c0_i32 = arith.constant 0 : i32
    %c0_i32_0 = arith.constant 0 : i32
    return %arg1, %c0_i32 : i32, i32
  }
}

</mosaic_0001>

<bundles_post_ra>
// kernel: tpu_custom_call.1
= control target key start
LH: loop header
LB: loop body
LE: loop exit
PB: predicated region body
PF: predicated region fallthrough
CT: control target
= control target key end

     0   :  { %8 = vsyncpa [#allocation4], 0  ;;  %s996_s0 = inlined_call_operand.hbm [shape: bf16[128,128], index: 0, kind: input, shape index: {}]   ;;  %s997_s1 = inlined_call_operand.hbm [shape: f32[128,128], index: 1, kind: input, shape index: {}]   ;;  %s998_s2 = inlined_call_operand.hbm [shape: bf16[128,128], index: 2, kind: input, shape index: {}]   ;;  %s999_s3 = inlined_call_operand.hbm [shape: f32[128,128], index: 3, kind: output, shape index: {}]  }
   0x1   :  { %9 = vsyncpa [#allocation7], 0 }
   0x2   :  { %10 = vsyncpa [#allocation5], 0  ;;  %s841_s12 = smov [#allocation6]   ;;  %s747_s16 = scalar_lea.hbm %s997_s1, 2048 }
   0x3   :  { %s28_s13 = sshll.u32 %s841_s12, 4  ;;  %p748_p0 = scmp.ne.s32.totalorder %s997_s1, %s747_s16  ;;  %s29_s13 = int_to_ptr.vmem [resolvable:$true] %s28_s13 }
   0x4   :  { %p751_p1 = scmp.lt.u32.totalorder %s747_s16, %s997_s1 }
   0x6   :  { %p753_p2 = pnand %p751_p1, %p748_p0 }
   0x8   :  { %756 = shalt.err (!%p753_p2)
}
   0x9   :  { %s757_s21 = scalar_lea.vmem %s29_s13, 2048  ;;  %p762_p4 = scmp.lt.s32.totalorder %s29_s13, %s29_s13 }
   0xa   :  { %p758_p3 = scmp.ne.s32.totalorder %s29_s13, %s757_s21  ;;  %p763_p5 = scmp.lt.s32.totalorder %s757_s21, %s757_s21 }
   0xc   :  { %p764_p6 = por %p763_p5, %p762_p4 }
   0xe   :  { %p765_p7 = pnand %p764_p6, %p758_p3 }
  0x10   :  { %768 = shalt.err (!%p765_p7)
}
  0x11   :  { %s842_s22 = smov 128   ;;  %s843_s23 = smov 8  }
  0x12   :  { %34 = dma.hbm_to_vmem [thread:$0]  %s997_s1, 2048, %s29_s13, [#allocation7], %s842_s22, %s842_s22, %s843_s23  }
  0x13   :  { %s844_s26 = smov [#allocation3]   ;;  %s769_s30 = scalar_lea.hbm %s996_s0, 1024 }
  0x14   :  { %s16_s27 = sshll.u32 %s844_s26, 4  ;;  %p770_p8 = scmp.ne.s32.totalorder %s996_s0, %s769_s30  ;;  %s17_s27 = int_to_ptr.vmem [resolvable:$true] %s16_s27 }
  0x15   :  { %p773_p9 = scmp.lt.u32.totalorder %s769_s30, %s996_s0 }
  0x17   :  { %p775_p10 = pnand %p773_p9, %p770_p8 }
  0x19   :  { %778 = shalt.err (!%p775_p10)
}
  0x1a   :  { %s779_s8 = scalar_lea.vmem %s17_s27, 1024  ;;  %p784_p12 = scmp.lt.s32.totalorder %s17_s27, %s17_s27 }
  0x1b   :  { %p780_p11 = scmp.ne.s32.totalorder %s17_s27, %s779_s8  ;;  %p785_p13 = scmp.lt.s32.totalorder %s779_s8, %s779_s8 }
  0x1d   :  { %p786_p0 = por %p785_p13, %p784_p12 }
  0x1f   :  { %p787_p1 = pnand %p786_p0, %p780_p11 }
  0x21   :  { %790 = shalt.err (!%p787_p1)
}
  0x22   :  { %s845_s1 = smov 64   ;;  %s846_s9 = smov 4  }
  0x23   :  { %22 = dma.hbm_to_vmem [thread:$0]  %s996_s0, 1024, %s17_s27, [#allocation4], %s845_s1, %s845_s1, %s846_s9  }
  0x24   :  { %s847_s12 = smov [#allocation8]   ;;  %s791_s16 = scalar_lea.hbm %s998_s2, 1024 }
  0x25   :  { %s40_s13 = sshll.u32 %s847_s12, 4  ;;  %p792_p2 = scmp.ne.s32.totalorder %s998_s2, %s791_s16  ;;  %s41_s13 = int_to_ptr.vmem [resolvable:$true] %s40_s13 }
  0x26   :  { %p795_p3 = scmp.lt.u32.totalorder %s791_s16, %s998_s2 }
  0x28   :  { %p797_p4 = pnand %p795_p3, %p792_p2 }
  0x2a   :  { %800 = shalt.err (!%p797_p4)
}
  0x2b   :  { %s801_s21 = scalar_lea.vmem %s41_s13, 1024  ;;  %p806_p6 = scmp.lt.s32.totalorder %s41_s13, %s41_s13 }
  0x2c   :  { %p802_p5 = scmp.ne.s32.totalorder %s41_s13, %s801_s21  ;;  %p807_p7 = scmp.lt.s32.totalorder %s801_s21, %s801_s21 }
  0x2e   :  { %p808_p8 = por %p807_p7, %p806_p6 }
  0x30   :  { %p809_p9 = pnand %p808_p8, %p802_p5 }
  0x32   :  { %812 = shalt.err (!%p809_p9)
}
  0x33   :  { %46 = dma.hbm_to_vmem [thread:$0]  %s998_s2, 1024, %s41_s13, [#allocation7], %s845_s1, %s845_s1, %s846_s9  }
  0x34   :  { %835 = dma.done.wait [#allocation4], 1024  }
  0x35   :  { %836 = vsyncadd [#allocation4], 4294966272 }
  0x36   :  { %837 = dma.done.wait [#allocation7], 3072  }
  0x37   :  { %838 = vsyncadd [#allocation7], 4294964224  ;;  %v848_v0 = vmov 0   ;;  %v910_v1 = vld [vmem:[#allocation6] sm:$0xff]  ;;  %v912_v2 = vld [vmem:[#allocation6 + $0x8] sm:$0xff]  ;;  %s849_s2 = smov [#allocation9]  }
  0x38   :  { %228 = vmatprep.mubr.bf16.mxu0 %v848_v0  ;;  %v914_v3 = vld [vmem:[#allocation6 + $0x10] sm:$0xff]  ;;  %v80_v4 = vpack.c.bf16 %v912_v2, %v910_v1  ;;  %v918_v5 = vld [vmem:[#allocation6 + $0x18] sm:$0xff]  ;;  %v922_v7 = vld [vmem:[#allocation6 + $0x20] sm:$0xff]  ;;  %s638_s25 = sshll.u32 %s849_s2, 4  ;;  %s639_s25 = int_to_ptr.vmem [resolvable:$true] %s638_s25 }
  0x39   :  { %v81_v6 = vpack.c.bf16 %v918_v5, %v914_v3  ;;  %v924_v8 = vld [vmem:[#allocation6 + $0x28] sm:$0xff]  ;;  %v928_v10 = vld [vmem:[#allocation6 + $0x30] sm:$0xff]  ;;  %v930_v11 = vld [vmem:[#allocation6 + $0x38] sm:$0xff]  ;;  %s813_s26 = scalar_lea.vmem %s639_s25, 2048  ;;  %p818_p11 = scmp.lt.s32.totalorder %s639_s25, %s639_s25 }
  0x3a   :  { %196 = vmatprep.subr.bf16.mxu0 %v80_v4  ;;  %v82_v9 = vpack.c.bf16 %v924_v8, %v922_v7  ;;  %v83_v12 = vpack.c.bf16 %v930_v11, %v928_v10  ;;  %v934_v13 = vld [vmem:[#allocation6 + $0x40] sm:$0xff]  ;;  %v936_v14 = vld [vmem:[#allocation6 + $0x48] sm:$0xff]  ;;  %v938_v15 = vld [vmem:[#allocation6 + $0x50] sm:$0xff]  ;;  %p814_p10 = scmp.ne.s32.totalorder %s639_s25, %s813_s26  ;;  %p819_p12 = scmp.lt.s32.totalorder %s813_s26, %s813_s26 }
  0x3b   :  { %197 = vmatpush1.bf16.msra.mxu0 %v80_v4  ;;  %v84_v16 = vpack.c.bf16 %v936_v14, %v934_v13  ;;  %v942_v17 = vld [vmem:[#allocation6 + $0x58] sm:$0xff]  ;;  %v739_v18 = vld [vmem:[#allocation8] sm:$0xff]   ;;  %v740_v19 = vld [vmem:[#allocation8 + $0x8] sm:$0xff]  }
  0x3c   :  { %198 = vmatprep.subr.bf16.mxu0 %v81_v6  ;;  %v944_v20 = vld [vmem:[#allocation6 + $0x60] sm:$0xff]  ;;  %v946_v21 = vld [vmem:[#allocation6 + $0x68] sm:$0xff]  ;;  %690 = vmatprep.subr.bf16.mxu1 %v739_v18  ;;  %v85_v22 = vpack.c.bf16 %v942_v17, %v938_v15  ;;  %v741_v23 = vld [vmem:[#allocation8 + $0x10] sm:$0xff]   ;;  %p820_p13 = por %p819_p12, %p818_p11 }
  0x3d   :  { %691 = vmatpush3.bf16.msra.mxu1 %v739_v18  ;;  %v86_v24 = vpack.c.bf16 %v946_v21, %v944_v20  ;;  %v952_v25 = vld [vmem:[#allocation6 + $0x70] sm:$0xff]  ;;  %v954_v26 = vld [vmem:[#allocation6 + $0x78] sm:$0xff]  ;;  %v731_v29 = vld [vmem:[#allocation3] sm:$0xff]  }
  0x3e   :  { %692 = vmatprep.subr.bf16.mxu1 %v740_v19  ;;  %v742_v27 = vld [vmem:[#allocation8 + $0x18] sm:$0xff]   ;;  %v87_v28 = vpack.c.bf16 %v954_v26, %v952_v25  ;;  %v732_v30 = vld [vmem:[#allocation3 + $0x8] sm:$0xff]   ;;  %v733_v31 = vld [vmem:[#allocation3 + $0x10] sm:$0xff]   ;;  %p821_p0 = pnand %p820_p13, %p814_p10 }
  0x3f   :  { %199 = vmatpush1.bf16.msra.mxu0 %v81_v6  ;;  %v734_v32 = vld [vmem:[#allocation3 + $0x18] sm:$0xff]   ;;  %v735_v33 = vld [vmem:[#allocation3 + $0x20] sm:$0xff]   ;;  %v736_v34 = vld [vmem:[#allocation3 + $0x28] sm:$0xff]  }
  0x40   :  { %200 = vmatprep.subr.bf16.mxu0 %v82_v9  ;;  %v737_v35 = vld [vmem:[#allocation3 + $0x30] sm:$0xff]   ;;  %v738_v36 = vld [vmem:[#allocation3 + $0x38] sm:$0xff]   ;;  %v743_v37 = vld [vmem:[#allocation8 + $0x20] sm:$0xff]  }
  0x41   :  { %693 = vmatpush3.bf16.msra.mxu1 %v740_v19  ;;  %v744_v38 = vld [vmem:[#allocation8 + $0x28] sm:$0xff]   ;;  %v745_v39 = vld [vmem:[#allocation8 + $0x30] sm:$0xff]   ;;  %v746_v40 = vld [vmem:[#allocation8 + $0x38] sm:$0xff]  }
  0x42   :  { %694 = vmatprep.subr.bf16.mxu1 %v741_v23 }
  0x43   :  { %201 = vmatpush1.bf16.msra.mxu0 %v82_v9 }
  0x44   :  { %202 = vmatprep.subr.bf16.mxu0 %v83_v12 }
  0x45   :  { %695 = vmatpush3.bf16.msra.mxu1 %v741_v23 }
  0x46   :  { %696 = vmatprep.subr.bf16.mxu1 %v742_v27 }
  0x47   :  { %203 = vmatpush1.bf16.msra.mxu0 %v83_v12 }
  0x48   :  { %204 = vmatprep.subr.bf16.mxu0 %v84_v16 }
  0x49   :  { %697 = vmatpush3.bf16.msra.mxu1 %v742_v27 }
  0x4a   :  { %698 = vmatprep.subr.bf16.mxu1 %v743_v37 }
  0x4b   :  { %205 = vmatpush1.bf16.msra.mxu0 %v84_v16 }
  0x4c   :  { %206 = vmatprep.subr.bf16.mxu0 %v85_v22 }
  0x4d   :  { %699 = vmatpush3.bf16.msra.mxu1 %v743_v37 }
  0x4e   :  { %700 = vmatprep.subr.bf16.mxu1 %v744_v38 }
  0x4f   :  { %207 = vmatpush1.bf16.msra.mxu0 %v85_v22 }
  0x50   :  { %208 = vmatprep.subr.bf16.mxu0 %v86_v24 }
  0x51   :  { %701 = vmatpush3.bf16.msra.mxu1 %v744_v38 }
  0x52   :  { %702 = vmatprep.subr.bf16.mxu1 %v745_v39 }
  0x53   :  { %209 = vmatpush1.bf16.msra.mxu0 %v86_v24 }
  0x54   :  { %210 = vmatprep.subr.bf16.mxu0 %v87_v28 }
  0x55   :  { %703 = vmatpush3.bf16.msra.mxu1 %v745_v39 }
  0x56   :  { %704 = vmatprep.subr.bf16.mxu1 %v746_v40 }
  0x57   :  { %211 = vmatpush1.bf16.msra.mxu0 %v87_v28 }
  0x59   :  { %705 = vmatpush3.bf16.msra.mxu1 %v746_v40 }
  0x5a   :  { %229 = vmatmul.mubr.bf16.vlgmr.msra.gmra.mrb[0].mxu0 %v731_v29 }
  0x5b   :  { %238 = vmatprep.mubr.bf16.mxu0 %v848_v0 }
  0x62   :  { %239 = vmatmul.mubr.bf16.gmra.mrb[4].mxu0 %v732_v30 }
  0x63   :  { %248 = vmatprep.mubr.bf16.mxu0 %v848_v0 }
  0x6a   :  { %249 = vmatmul.mubr.bf16.gmra.mrb[8].mxu0 %v733_v31 }
  0x6b   :  { %258 = vmatprep.mubr.bf16.mxu0 %v848_v0 }
  0x72   :  { %259 = vmatmul.mubr.bf16.gmra.mrb[12].mxu0 %v734_v32 }
  0x73   :  { %268 = vmatprep.mubr.bf16.mxu0 %v848_v0 }
  0x7a   :  { %269 = vmatmul.mubr.bf16.gmra.mrb[16].mxu0 %v735_v33 }
  0x7b   :  { %278 = vmatprep.mubr.bf16.mxu0 %v848_v0 }
  0x82   :  { %279 = vmatmul.mubr.bf16.gmra.mrb[20].mxu0 %v736_v34 }
  0x83   :  { %288 = vmatprep.mubr.bf16.mxu0 %v848_v0 }
  0x8a   :  { %289 = vmatmul.mubr.bf16.gmra.mrb[24].mxu0 %v737_v35 }
  0x8b   :  { %298 = vmatprep.mubr.bf16.mxu0 %v848_v0 }
  0x92   :  { %299 = vmatmul.mubr.bf16.gmra.mrb[28].mxu0 %v738_v36 }
 0x12d   :  { %v230_v41 = vpop.f32.mrb[0].mxu0 }
 0x12e   :  { %v232_v42 = vpop.f32.mrb[1].mxu0 }
 0x12f   :  { %v326_v43 = vsub.f32 %v910_v1, %v232_v42  ;;  %v234_v44 = vpop.f32.mrb[2].mxu0 }
 0x130   :  { %v236_v45 = vpop.f32.mrb[3].mxu0 }
 0x131   :  { %v327_v46 = vsub.f32 %v912_v2, %v236_v45  ;;  %v381_v47 = vmul.f32 %v326_v43, %v230_v41 }
 0x133   :  { %v382_v48 = vmul.f32 %v327_v46, %v234_v44 }
 0x135   :  { %v240_v49 = vpop.f32.mrb[4].mxu0  ;;  %v400_v50 = vpack.c.bf16 %v382_v48, %v381_v47 }
 0x136   :  { %v242_v51 = vpop.f32.mrb[5].mxu0 }
 0x137   :  { %v328_v52 = vsub.f32 %v914_v3, %v242_v51  ;;  %v244_v53 = vpop.f32.mrb[6].mxu0  ;;  %706 = vmatprep.mubr.bf16.mxu1 %v400_v50 }
 0x138   :  { %v246_v54 = vpop.f32.mrb[7].mxu0 }
 0x139   :  { %v383_v55 = vmul.f32 %v328_v52, %v240_v49  ;;  %v329_v56 = vsub.f32 %v918_v5, %v246_v54 }
 0x13b   :  { %v384_v57 = vmul.f32 %v329_v56, %v244_v53 }
 0x13d   :  { %v250_v58 = vpop.f32.mrb[8].mxu0  ;;  %v401_v59 = vpack.c.bf16 %v384_v57, %v383_v55 }
 0x13e   :  { %v252_v60 = vpop.f32.mrb[9].mxu0 }
 0x13f   :  { %v330_v61 = vsub.f32 %v922_v7, %v252_v60  ;;  %v254_v62 = vpop.f32.mrb[10].mxu0  ;;  %707 = vmatmul.mubr.bf16.vlgmr.msra.gmra.mrb[0].mxu1 %v401_v59 }
 0x140   :  { %v256_v63 = vpop.f32.mrb[11].mxu0 }
 0x141   :  { %v385_v0 = vmul.f32 %v330_v61, %v250_v58  ;;  %v331_v1 = vsub.f32 %v924_v8, %v256_v63 }
 0x143   :  { %v386_v2 = vmul.f32 %v331_v1, %v254_v62 }
 0x145   :  { %v260_v3 = vpop.f32.mrb[12].mxu0  ;;  %v402_v4 = vpack.c.bf16 %v386_v2, %v385_v0 }
 0x146   :  { %v262_v6 = vpop.f32.mrb[13].mxu0 }
 0x147   :  { %v332_v9 = vsub.f32 %v928_v10, %v262_v6  ;;  %v264_v12 = vpop.f32.mrb[14].mxu0  ;;  %710 = vmatprep.mubr.bf16.mxu1 %v402_v4 }
 0x148   :  { %v266_v5 = vpop.f32.mrb[15].mxu0 }
 0x149   :  { %v387_v16 = vmul.f32 %v332_v9, %v260_v3  ;;  %v333_v18 = vsub.f32 %v930_v11, %v266_v5 }
 0x14b   :  { %v388_v19 = vmul.f32 %v333_v18, %v264_v12 }
 0x14d   :  { %v270_v7 = vpop.f32.mrb[16].mxu0  ;;  %v403_v22 = vpack.c.bf16 %v388_v19, %v387_v16 }
 0x14e   :  { %v272_v23 = vpop.f32.mrb[17].mxu0 }
 0x14f   :  { %v334_v24 = vsub.f32 %v934_v13, %v272_v23  ;;  %v274_v27 = vpop.f32.mrb[18].mxu0  ;;  %711 = vmatmul.mubr.bf16.gmra.mrb[4].mxu1 %v403_v22 }
 0x150   :  { %v276_v8 = vpop.f32.mrb[19].mxu0 }
 0x151   :  { %v389_v28 = vmul.f32 %v334_v24, %v270_v7  ;;  %v335_v29 = vsub.f32 %v936_v14, %v276_v8 }
 0x153   :  { %v390_v30 = vmul.f32 %v335_v29, %v274_v27 }
 0x155   :  { %v280_v10 = vpop.f32.mrb[20].mxu0  ;;  %v404_v31 = vpack.c.bf16 %v390_v30, %v389_v28 }
 0x156   :  { %v282_v32 = vpop.f32.mrb[21].mxu0 }
 0x157   :  { %v336_v33 = vsub.f32 %v938_v15, %v282_v32  ;;  %v284_v34 = vpop.f32.mrb[22].mxu0  ;;  %714 = vmatprep.mubr.bf16.mxu1 %v404_v31 }
 0x158   :  { %v286_v11 = vpop.f32.mrb[23].mxu0 }
 0x159   :  { %v391_v35 = vmul.f32 %v336_v33, %v280_v10  ;;  %v337_v36 = vsub.f32 %v942_v17, %v286_v11 }
 0x15b   :  { %v392_v37 = vmul.f32 %v337_v36, %v284_v34 }
 0x15d   :  { %v290_v13 = vpop.f32.mrb[24].mxu0  ;;  %v405_v38 = vpack.c.bf16 %v392_v37, %v391_v35 }
 0x15e   :  { %v292_v39 = vpop.f32.mrb[25].mxu0 }
 0x15f   :  { %v338_v40 = vsub.f32 %v944_v20, %v292_v39  ;;  %v294_v41 = vpop.f32.mrb[26].mxu0  ;;  %715 = vmatmul.mubr.bf16.gmra.mrb[8].mxu1 %v405_v38 }
 0x160   :  { %v296_v14 = vpop.f32.mrb[27].mxu0 }
 0x161   :  { %v393_v42 = vmul.f32 %v338_v40, %v290_v13  ;;  %v339_v43 = vsub.f32 %v946_v21, %v296_v14 }
 0x163   :  { %v394_v44 = vmul.f32 %v339_v43, %v294_v41 }
 0x165   :  { %v300_v15 = vpop.f32.mrb[28].mxu0  ;;  %v406_v45 = vpack.c.bf16 %v394_v44, %v393_v42 }
 0x166   :  { %v302_v46 = vpop.f32.mrb[29].mxu0 }
 0x167   :  { %v340_v47 = vsub.f32 %v952_v25, %v302_v46  ;;  %v304_v48 = vpop.f32.mrb[30].mxu0  ;;  %718 = vmatprep.mubr.bf16.mxu1 %v406_v45 }
 0x168   :  { %v306_v17 = vpop.f32.mrb[31].mxu0 }
 0x169   :  { %v395_v49 = vmul.f32 %v340_v47, %v300_v15  ;;  %v341_v50 = vsub.f32 %v954_v26, %v306_v17 }
 0x16b   :  { %v396_v51 = vmul.f32 %v341_v50, %v304_v48 }
 0x16d   :  { %v407_v20 = vpack.c.bf16 %v396_v51, %v395_v49 }
 0x16f   :  { %719 = vmatmul.mubr.bf16.gmra.mrb[12].mxu1 %v407_v20 }
 0x212   :  { %v708_v52 = vpop.f32.mrb[0].mxu1 }
 0x213   :  { %vm571_vm0 = vcmp.ge.f32.partialorder %v708_v52, 0.0  ;;  %v587_v53 = vmul.f32 0.01, %v708_v52  ;;  %v506_v54 = vpop.f32.mrb[1].mxu1 }
 0x214   :  { %vm569_vm1 = vcmp.ge.f32.partialorder %v506_v54, 0.0  ;;  %v585_v21 = vmul.f32 0.01, %v506_v54  ;;  %v709_v55 = vpop.f32.mrb[2].mxu1 }
 0x215   :  { %v603_v56 = vsel %vm571_vm0, %v708_v52, %v587_v53  ;;  %vm572_vm2 = vcmp.ge.f32.partialorder %v709_v55, 0.0  ;;  %v588_v57 = vmul.f32 0.01, %v709_v55  ;;  %v509_v25 = vpop.f32.mrb[3].mxu1 }
 0x216   :  { %619 = vst [vmem:[#allocation9 + $0x10] sm:$0xff] %v603_v56  ;;  %v601_v58 = vsel %vm569_vm1, %v506_v54, %v585_v21  ;;  %vm570_vm3 = vcmp.ge.f32.partialorder %v509_v25, 0.0  ;;  %v586_v59 = vmul.f32 0.01, %v509_v25 }
 0x217   :  { %617 = vst [vmem:[#allocation9] sm:$0xff] %v601_v58  ;;  %v604_v26 = vsel %vm572_vm2, %v709_v55, %v588_v57 }
 0x218   :  { %620 = vst [vmem:[#allocation9 + $0x18] sm:$0xff] %v604_v26  ;;  %v602_v60 = vsel %vm570_vm3, %v509_v25, %v586_v59 }
 0x219   :  { %618 = vst [vmem:[#allocation9 + $0x8] sm:$0xff] %v602_v60 }
 0x222   :  { %v712_v61 = vpop.f32.mrb[4].mxu1 }
 0x223   :  { %vm575_vm4 = vcmp.ge.f32.partialorder %v712_v61, 0.0  ;;  %v591_v62 = vmul.f32 0.01, %v712_v61  ;;  %v522_v63 = vpop.f32.mrb[5].mxu1 }
 0x224   :  { %vm573_vm5 = vcmp.ge.f32.partialorder %v522_v63, 0.0  ;;  %v589_v0 = vmul.f32 0.01, %v522_v63  ;;  %v713_v1 = vpop.f32.mrb[6].mxu1 }
 0x225   :  { %v607_v2 = vsel %vm575_vm4, %v712_v61, %v591_v62  ;;  %vm576_vm6 = vcmp.ge.f32.partialorder %v713_v1, 0.0  ;;  %v592_v3 = vmul.f32 0.01, %v713_v1  ;;  %v525_v4 = vpop.f32.mrb[7].mxu1 }
 0x226   :  { %623 = vst [vmem:[#allocation9 + $0x30] sm:$0xff] %v607_v2  ;;  %v605_v6 = vsel %vm573_vm5, %v522_v63, %v589_v0  ;;  %vm574_vm7 = vcmp.ge.f32.partialorder %v525_v4, 0.0  ;;  %v590_v9 = vmul.f32 0.01, %v525_v4 }
 0x227   :  { %621 = vst [vmem:[#allocation9 + $0x20] sm:$0xff] %v605_v6  ;;  %v608_v12 = vsel %vm576_vm6, %v713_v1, %v592_v3 }
 0x228   :  { %624 = vst [vmem:[#allocation9 + $0x38] sm:$0xff] %v608_v12  ;;  %v606_v5 = vsel %vm574_vm7, %v525_v4, %v590_v9 }
 0x229   :  { %622 = vst [vmem:[#allocation9 + $0x28] sm:$0xff] %v606_v5 }
 0x232   :  { %v716_v16 = vpop.f32.mrb[8].mxu1 }
 0x233   :  { %vm579_vm8 = vcmp.ge.f32.partialorder %v716_v16, 0.0  ;;  %v595_v18 = vmul.f32 0.01, %v716_v16  ;;  %v538_v19 = vpop.f32.mrb[9].mxu1 }
 0x234   :  { %vm577_vm9 = vcmp.ge.f32.partialorder %v538_v19, 0.0  ;;  %v593_v7 = vmul.f32 0.01, %v538_v19  ;;  %v717_v22 = vpop.f32.mrb[10].mxu1 }
 0x235   :  { %v611_v23 = vsel %vm579_vm8, %v716_v16, %v595_v18  ;;  %vm580_vm10 = vcmp.ge.f32.partialorder %v717_v22, 0.0  ;;  %v596_v24 = vmul.f32 0.01, %v717_v22  ;;  %v541_v27 = vpop.f32.mrb[11].mxu1 }
 0x236   :  { %627 = vst [vmem:[#allocation9 + $0x50] sm:$0xff] %v611_v23  ;;  %v609_v8 = vsel %vm577_vm9, %v538_v19, %v593_v7  ;;  %vm578_vm11 = vcmp.ge.f32.partialorder %v541_v27, 0.0  ;;  %v594_v28 = vmul.f32 0.01, %v541_v27 }
 0x237   :  { %625 = vst [vmem:[#allocation9 + $0x40] sm:$0xff] %v609_v8  ;;  %v612_v29 = vsel %vm580_vm10, %v717_v22, %v596_v24 }
 0x238   :  { %628 = vst [vmem:[#allocation9 + $0x58] sm:$0xff] %v612_v29  ;;  %v610_v30 = vsel %vm578_vm11, %v541_v27, %v594_v28 }
 0x239   :  { %626 = vst [vmem:[#allocation9 + $0x48] sm:$0xff] %v610_v30 }
 0x242   :  { %v720_v10 = vpop.f32.mrb[12].mxu1 }
 0x243   :  { %vm583_vm12 = vcmp.ge.f32.partialorder %v720_v10, 0.0  ;;  %v599_v31 = vmul.f32 0.01, %v720_v10  ;;  %v554_v32 = vpop.f32.mrb[13].mxu1 }
 0x244   :  { %vm581_vm13 = vcmp.ge.f32.partialorder %v554_v32, 0.0  ;;  %v597_v33 = vmul.f32 0.01, %v554_v32  ;;  %v721_v34 = vpop.f32.mrb[14].mxu1 }
 0x245   :  { %v615_v11 = vsel %vm583_vm12, %v720_v10, %v599_v31  ;;  %vm584_vm14 = vcmp.ge.f32.partialorder %v721_v34, 0.0  ;;  %v600_v35 = vmul.f32 0.01, %v721_v34  ;;  %v557_v36 = vpop.f32.mrb[15].mxu1 }
 0x246   :  { %631 = vst [vmem:[#allocation9 + $0x70] sm:$0xff] %v615_v11  ;;  %v613_v37 = vsel %vm581_vm13, %v554_v32, %v597_v33  ;;  %vm582_vm15 = vcmp.ge.f32.partialorder %v557_v36, 0.0  ;;  %v598_v13 = vmul.f32 0.01, %v557_v36 }
 0x247   :  { %629 = vst [vmem:[#allocation9 + $0x60] sm:$0xff] %v613_v37  ;;  %v616_v38 = vsel %vm584_vm14, %v721_v34, %v600_v35 }
 0x248   :  { %632 = vst [vmem:[#allocation9 + $0x78] sm:$0xff] %v616_v38  ;;  %v614_v39 = vsel %vm582_vm15, %v557_v36, %v598_v13 }
 0x249   :  { %630 = vst [vmem:[#allocation9 + $0x68] sm:$0xff] %v614_v39 }
 0x24a   :  { %824 = shalt.err (!%p821_p0)
}
 0x24b   :  { %s825_s29 = scalar_lea.hbm %s999_s3, 2048 }
 0x24c   :  { %p826_p1 = scmp.ne.s32.totalorder %s999_s3, %s825_s29  ;;  %p829_p2 = scmp.lt.u32.totalorder %s825_s29, %s999_s3 }
 0x24e   :  { %p831_p3 = pnand %p829_p2, %p826_p1 }
 0x250   :  { %834 = shalt.err (!%p831_p3)
}
 0x251   :  { %644 = dma.vmem_to_hbm [thread:$0]  %s639_s25, 2048, %s999_s3, [#allocation5], %s842_s22, %s842_s22, %s843_s23  }
 0x252   :  { %839 = dma.done.wait [#allocation5], 2048  }
 0x253   :  { %840 = vsyncadd [#allocation5], 4294965248 }
 0x254   :  { %648 = vsyncpa [#allocation4], 1 }
 0x255   :  { %649 = vsyncpa [#allocation7], 1 }
 0x256   :  { %650 = vsyncpa [#allocation5], 1 }

</bundles_post_ra>
